<compile_context>
chip_gen: v7x
topology: tpu7x:2x2x1
jax: 0.10.0
libtpu: 0.0.40
codegen_flags: <defaults>
</compile_context>

<pallas_src>
import functools

import jax
import jax.numpy as jnp
from jax.experimental import pallas as pl
from jax.experimental.pallas import tpu as pltpu


# ---------------------------------------------------------------------------
# Hardware / capability probing
# ---------------------------------------------------------------------------
def _device_kind():
    try:
        return jax.devices()[0].device_kind.lower()
    except Exception:
        return ""


@functools.lru_cache(maxsize=None)
def _vmem_capacity_bytes():
    try:
        return int(pltpu.get_tpu_info().vmem_capacity_bytes)
    except Exception:
        pass
    kind = _device_kind()                      # review fix: generation-aware fallback
    if "v7" in kind:
        return 64 * 1024 * 1024
    if any(t in kind for t in ("v5 lite", "v5e", "v5p", "v6")):
        return 128 * 1024 * 1024
    return 64 * 1024 * 1024                    # conservative unknown-device fallback


def _vmem_budgets():
    cap = _vmem_capacity_bytes()
    tile_budget = min(int(cap * 0.40), 48 * 1024 * 1024)   # for tile selection
    vmem_limit = max(32 * 1024 * 1024, min(int(cap * 0.75), 100 * 1024 * 1024))
    return tile_budget, vmem_limit


@functools.lru_cache(maxsize=None)
def _pipeline_modes_supported():
    """One-time probe for BlockSpec(pipeline_mode=pl.Buffered(k)).

    Review fix: the old per-call try/except cannot catch Mosaic lowering
    errors that surface at jit-compile time, so probe once with a tiny eager
    kernel that mirrors the real usage (Buffered(1) on a grid-invariant block,
    Buffered(3) on a streamed block) and cache the result.
    """
    def k(a_ref, c_ref, o_ref):
        o_ref[...] = a_ref[...] + c_ref[...]

    try:
        a = jnp.zeros((32, 128), jnp.float32)
        c = jnp.ones((8, 128), jnp.float32)
        out = pl.pallas_call(
            k,
            out_shape=jax.ShapeDtypeStruct((32, 128), jnp.float32),
            grid_spec=pltpu.PrefetchScalarGridSpec(
                num_scalar_prefetch=0,
                grid=(4,),
                in_specs=[
                    pl.BlockSpec((8, 128), lambda i: (i, 0),
                                 pipeline_mode=pl.Buffered(3)),
                    pl.BlockSpec((8, 128), lambda i: (0, 0),
                                 pipeline_mode=pl.Buffered(1)),
                ],
                out_specs=pl.BlockSpec((8, 128), lambda i: (i, 0)),
            ),
        )(a, c)
        return bool(jax.block_until_ready(jnp.allclose(out, 1.0)))
    except Exception:
        return False


def _default_lhs_dtype():
    # v5e: bf16-native MXU; f32 operands are slow and double HBM traffic.
    kind = _device_kind()
    if "v5 lite" in kind or "v5e" in kind:
        return jnp.bfloat16
    return None                                # keep input dtype (f32 -> 1e-5 check)


# ---------------------------------------------------------------------------
# Tiling heuristics
# ---------------------------------------------------------------------------
def _round_up(x, m):
    return -(-x // m) * m


def _choose_tn(Kout, Cin, w_itemsize, tile_budget):
    """Kout (= 4*out_feat) column tile.  Keep the full weight resident when it
    is small; otherwise stream lane-aligned column blocks so tm never collapses
    and the weight cannot VMEM-OOM (v7x 64 MiB / deep U-Net levels)."""
    resident_worst = 2 * Kout * (Cin * w_itemsize + 4)     # double-buffered + f32 bias
    if Kout <= 1024 or resident_worst <= int(0.4 * tile_budget):
        return Kout
    for cand in (1024, 896, 768, 640, 512, 384, 256, 128):
        if Kout % cand == 0:
            return cand
    return Kout   # TODO(synk): pad Kout when no lane-aligned divisor exists


def _choose_tm(M, Cin, tn, lhs_itemsize, out_itemsize, tile_budget,
               resident_bytes, lhs_buffers):
    """Largest M-tile that fits the VMEM budget, capped at 1024 rows AND at
    ceil(M/8) so the grid always has >= 8 steps (>= 4 per TensorCore on v7x)
    and the software pipeline has real depth."""
    per_row = lhs_buffers * lhs_itemsize * Cin + 2 * out_itemsize * tn
    avail = max(tile_budget - resident_bytes, per_row * 16)
    tm = avail // per_row
    tm = min(tm, 1024, _round_up(-(-M // 8), 8))
    return int(max(8, (tm // 8) * 8))


# ---------------------------------------------------------------------------
# Pallas kernel: tiled (M, Cin) x (Cin, 4*Cout) matmul + bias
# ---------------------------------------------------------------------------
def _deconv_matmul_kernel(x_ref, w_ref, b_ref, o_ref):
    # x_ref: (tm, Cin)   w_ref: (Cin, tn)   b_ref: (1, tn) f32   o_ref: (tm, tn)
    acc = jnp.dot(x_ref[...], w_ref[...], preferred_element_type=jnp.float32)
    o_ref[...] = (acc + b_ref[...]).astype(o_ref.dtype)


def _deconv_matmul(x2d, w2d, b2d, *, tm, tn, out_dtype, vmem_limit,
                   lhs_buffers, true_m):
    """x2d: (M_pad, Cin), w2d: (Cin, Kout), b2d: (1, Kout) f32 -> (M_pad, Kout)."""
    M_pad, Cin = x2d.shape
    Kout = w2d.shape[1]
    assert M_pad % tm == 0 and Kout % tn == 0
    ni, nj = M_pad // tm, Kout // tn

    lhs_kwargs, const_kwargs = {}, {}
    if _pipeline_modes_supported():
        if lhs_buffers != 2:
            lhs_kwargs = dict(pipeline_mode=pl.Buffered(lhs_buffers))
        if nj == 1:
            # Grid-invariant weight/bias: keep a single resident copy.
            const_kwargs = dict(pipeline_mode=pl.Buffered(1))

    cost = pl.CostEstimate(                     # un-padded M (review fix)
        flops=2 * true_m * Cin * Kout,
        transcendentals=0,
        bytes_accessed=(true_m * Cin * jnp.dtype(x2d.dtype).itemsize
                        + Cin * Kout * jnp.dtype(w2d.dtype).itemsize
                        + Kout * 4
                        + true_m * Kout * jnp.dtype(out_dtype).itemsize),
    )

    return pl.pallas_call(
        _deconv_matmul_kernel,
        out_shape=jax.ShapeDtypeStruct((M_pad, Kout), out_dtype),
        grid_spec=pltpu.PrefetchScalarGridSpec(
            num_scalar_prefetch=0,
            grid=(ni, nj),                      # j inner: LHS block reused across j
            in_specs=[
                pl.BlockSpec((tm, Cin), lambda i, j: (i, 0), **lhs_kwargs),
                pl.BlockSpec((Cin, tn), lambda i, j: (0, j), **const_kwargs),
                pl.BlockSpec((1, tn), lambda i, j: (0, j), **const_kwargs),
            ],
            out_specs=pl.BlockSpec((tm, tn), lambda i, j: (i, j)),
        ),
        compiler_params=pltpu.CompilerParams(
            dimension_semantics=("parallel", "arbitrary"),
            vmem_limit_bytes=int(vmem_limit),
        ),
        cost_estimate=cost,
    )(x2d, w2d, b2d)


# ---------------------------------------------------------------------------
# Module wrapper
# ---------------------------------------------------------------------------
class UpconvPallas:
    """Pallas TPU re-implementation of the PyTorch `Upconv` forward pass.

    forward(x, output_down) = cat([output_down, ConvTranspose2d(k=2, s=2)(x)], dim=1)
    I/O layout is NCHW to match PyTorch.  compute_dtype="auto" uses bf16
    operands on v5e (f32 accumulation kept) and f32 elsewhere; pass
    jnp.bfloat16 / None to force.  out_dtype=None keeps the input dtype.
    """

    def __init__(self, in_feat, out_feat, key, compute_dtype="auto",
                 out_dtype=None, lhs_buffers=3):
        self.in_feat = in_feat
        self.out_feat = out_feat
        if compute_dtype == "auto":
            compute_dtype = _default_lhs_dtype()
        self.compute_dtype = compute_dtype
        self.out_dtype = out_dtype
        self.lhs_buffers = int(lhs_buffers)     # sweepable pipeline depth for LHS
        kw_, kb_ = jax.random.split(key)
        # PyTorch ConvTranspose2d weight layout: (in_ch, out_ch, kH, kW), kH = kW = 2
        bound = 1.0 / (in_feat * 2 * 2) ** 0.5
        self.weight = jax.random.uniform(
            kw_, (in_feat, out_feat, 2, 2), jnp.float32, -bound, bound)
        self.bias = jax.random.uniform(
            kb_, (out_feat,), jnp.float32, -bound, bound)

    def __call__(self, x, output_down):
        # x: (N, Cin, H, W) NCHW   output_down: (N, Cd, 2H, 2W) NCHW
        N, Cin, H, W = x.shape
        assert Cin == self.in_feat
        Cout = self.out_feat
        Kout = 4 * Cout
        out_dtype = self.out_dtype if self.out_dtype is not None else x.dtype

        # ---- glue: NCHW -> flattened NHWC LHS (smallest tensor) --------------
        # TODO(synk): fold this transpose into the kernel (read (Cin, W) slabs
        # of a (N*H, Cin, W) view per grid row).
        x2d = jnp.transpose(x, (0, 2, 3, 1)).reshape(N * H * W, Cin)

        # RHS columns ordered (kh, kw, oc): (Cin, 4*Cout)
        w2d = jnp.transpose(self.weight, (0, 2, 3, 1)).reshape(Cin, Kout)
        b2d = jnp.tile(self.bias, 4).reshape(1, Kout)          # stays f32

        if self.compute_dtype is not None:
            x2d = x2d.astype(self.compute_dtype)
            w2d = w2d.astype(self.compute_dtype)

        # ---- tile sizing (VMEM-budget driven, generation aware) --------------
        M = N * H * W
        tile_budget, vmem_limit = _vmem_budgets()
        lhs_item = jnp.dtype(x2d.dtype).itemsize
        w_item = jnp.dtype(w2d.dtype).itemsize
        out_item = jnp.dtype(out_dtype).itemsize

        tn = _choose_tn(Kout, Cin, w_item, tile_budget)
        nj = Kout // tn
        weight_copies = 1 if (nj == 1 and _pipeline_modes_supported()) else 2
        resident = weight_copies * tn * (Cin * w_item + 4)
        tm = _choose_tm(M, Cin, tn, lhs_item, out_item, tile_budget,
                        resident, self.lhs_buffers)

        M_pad = _round_up(M, tm)
        if M_pad != M:
            x2d = jnp.pad(x2d, ((0, M_pad - M), (0, 0)))

        # ---- hot path: Pallas matmul + bias ----------------------------------
        y2d = _deconv_matmul(x2d, w2d, b2d, tm=tm, tn=tn, out_dtype=out_dtype,
                             vmem_limit=vmem_limit, lhs_buffers=self.lhs_buffers,
                             true_m=M)
        if M_pad != M:
            y2d = y2d[:M]

        # ---- glue: pixel-shuffle back to NCHW + channel concat ---------------
        # TODO(synk): fuse this pixel-shuffle + concat into the kernel (see
        # header TODO) to remove the remaining HBM passes over the output.
        y = y2d.reshape(N, H, W, 2, 2, Cout)
        deconv_out = jnp.transpose(y, (0, 5, 1, 3, 2, 4)).reshape(N, Cout, 2 * H, 2 * W)
        return jnp.concatenate([output_down, deconv_out], axis=1)


# ---------------------------------------------------------------------------
# Pure-JAX reference (ConvTranspose2d k=2, s=2 + channel concat)
# ---------------------------------------------------------------------------
def _reference(x, output_down, weight, bias):
    N, Cin, H, W = x.shape
    Cout = weight.shape[1]
    # out[n, oc, 2h+kh, 2w+kw] = sum_ic x[n, ic, h, w] * W[ic, oc, kh, kw] + b[oc]
    y = jnp.einsum("nchw,codk->nohdwk", x, weight) + bias[None, :, None, None, None, None]
    y = y.reshape(N, Cout, 2 * H, 2 * W)
    return jnp.concatenate([output_down, y], axis=1)


if __name__ == "__main__":
    key = jax.random.PRNGKey(0)
    k_mod, k_x, k_d = jax.random.split(key, 3)

    N, in_feat, out_feat, H, W = 2, 4, 4, 16, 16
    mod = UpconvPallas(in_feat, out_feat, k_mod)   # compute dtype: auto (bf16 on v5e)

    x = jax.random.normal(k_x, (N, in_feat, H, W), jnp.float32)
    output_down = jax.random.normal(k_d, (N, out_feat, 2 * H, 2 * W), jnp.float32)

    out = jax.block_until_ready(mod(x, output_down))

    ref = _reference(x, output_down, mod.weight, mod.bias)
    tol = 3e-2 if mod.compute_dtype == jnp.bfloat16 else 1e-5
    assert out.shape == (N, 2 * out_feat, 2 * H, 2 * W), out.shape
    assert jnp.allclose(out, ref, atol=tol, rtol=tol), "mismatch vs reference"

    print("KERNEL_OK")
</pallas_src>

<mosaic_0001>
module attributes {stable_mosaic.version = 11 : i64} {
  func.func @_deconv_matmul_kernel(%arg0: i32, %arg1: i32, %arg2: memref<64x4xf32, #tpu.memory_space<vmem>>, %arg3: memref<4x16xf32, #tpu.memory_space<vmem>>, %arg4: memref<1x16xf32, #tpu.memory_space<vmem>>, %arg5: memref<64x16xf32, #tpu.memory_space<vmem>>) attributes {dimension_semantics = [#tpu.dimension_semantics<parallel>, #tpu.dimension_semantics<arbitrary>], iteration_bounds = array<i64: 8, 1>, scalar_prefetch = 0 : i64, scratch_operands = 0 : i64, tpu.core_type = #tpu.core_type<tc>, window_params = [{transform_indices = @transform_0, window_bounds = array<i64: 64, 4>}, {transform_indices = @transform_1, window_bounds = array<i64: 4, 16>}, {transform_indices = @transform_2, window_bounds = array<i64: 1, 16>}, {transform_indices = @transform_3, window_bounds = array<i64: 64, 16>}]} {
    %c0 = arith.constant 0 : index
    %c0_0 = arith.constant 0 : index
    %0 = vector.load %arg2[%c0, %c0_0] : memref<64x4xf32, #tpu.memory_space<vmem>>, vector<64x4xf32>
    %c0_1 = arith.constant 0 : index
    %c0_2 = arith.constant 0 : index
    %1 = vector.load %arg3[%c0_1, %c0_2] : memref<4x16xf32, #tpu.memory_space<vmem>>, vector<4x16xf32>
    %cst = arith.constant dense<0.000000e+00> : vector<64x16xf32>
    %2 = tpu.matmul %0, %1, %cst {dimension_numbers = #tpu.dot_dimension_numbers<[1], [0], [0], [1], [0, 0, 1, 1], [], []>} : vector<64x4xf32>, vector<4x16xf32>, vector<64x16xf32> -> vector<64x16xf32>
    %c0_3 = arith.constant 0 : index
    %c0_4 = arith.constant 0 : index
    %3 = vector.load %arg4[%c0_3, %c0_4] : memref<1x16xf32, #tpu.memory_space<vmem>>, vector<1x16xf32>
    %4 = vector.broadcast %3 : vector<1x16xf32> to vector<64x16xf32>
    %5 = arith.addf %2, %4 : vector<64x16xf32>
    %c0_5 = arith.constant 0 : index
    %c0_6 = arith.constant 0 : index
    %6 = vector.load %arg5[%c0_5, %c0_6] : memref<64x16xf32, #tpu.memory_space<vmem>>, vector<64x16xf32>
    tpu.vector_store %arg5[%c0_5, %c0_6], %5 {strides = array<i32>} : memref<64x16xf32, #tpu.memory_space<vmem>>, vector<64x16xf32>,
    return
  }
  func.func @transform_0(%arg0: i32, %arg1: i32) -> (i32, i32) {
    %c0_i32 = arith.constant 0 : i32
    %c0_i32_0 = arith.constant 0 : i32
    return %arg0, %c0_i32 : i32, i32
  }
  func.func @transform_1(%arg0: i32, %arg1: i32) -> (i32, i32) {
    %c0_i32 = arith.constant 0 : i32
    %c0_i32_0 = arith.constant 0 : i32
    return %c0_i32, %arg1 : i32, i32
  }
  func.func @transform_2(%arg0: i32, %arg1: i32) -> (i32, i32) {
    %c0_i32 = arith.constant 0 : i32
    %c0_i32_0 = arith.constant 0 : i32
    return %c0_i32, %arg1 : i32, i32
  }
  func.func @transform_3(%arg0: i32, %arg1: i32) -> (i32, i32) {
    %c0_i32 = arith.constant 0 : i32
    return %arg0, %arg1 : i32, i32
  }
}

</mosaic_0001>

<bundles_post_ra>
// kernel: tpu_custom_call.1
= control target key start
LH: loop header
LB: loop body
LE: loop exit
PB: predicated region body
PF: predicated region fallthrough
CT: control target
= control target key end

     0   :  { %s602_s12 = smov 0   ;;  %s604_s13 = smov 0   ;;  %s657_s0 = inlined_call_operand.vmem [shape: f32[512,4], index: 0, kind: input, shape index: {}]   ;;  %s658_s1 = inlined_call_operand.vmem [shape: f32[4,16], index: 1, kind: input, shape index: {}]   ;;  %s659_s2 = inlined_call_operand.vmem [shape: f32[1,16], index: 2, kind: input, shape index: {}]   ;;  %s660_s3 = inlined_call_operand.vmem [shape: f32[512,16], index: 3, kind: output, shape index: {}]  }
   0x1   :  { %s606_s14 = smov 0  }
   0x2 LB: > { %s25_s15 = sadd.s32 1, %s576_s13  ;;  %p492_p0 = scmp.ge.s32.totalorder %s580_s14, 1  ;;  %s580_s14 = sphi %s606_s14, %s13_s14   ;;  %s576_s13 = sphi %s604_s13, %s662_s13   ;;  %s572_s12 = sphi %s602_s12, %s661_s12  }
   0x3   : > { %p27_p1 = scmp.ge.s32.totalorder %s25_s15, 8  ;;  %p169_p2 = scmp.lt.s32.totalorder %s580_s14, 9 }
   0x5   : > { %s664_s15 = smov (%p27_p1, %s25_s15), 0  ;;  %p170_p3 = pnand %p492_p0, %p169_p2 }
   0x6   : > { %v233_v0 = vld [vmem:[%s658_s1] sm:$0xf] (!%p170_p3)  ;;  %vm266_vm0 = vcmask (!%p170_p3), 1043456   ;;  %s493_s18 = sshll.u32 (!%p170_p3), %s572_s12, 3  ;;  %vm241_vm1 = vcmask (!%p170_p3), 31744   ;;  %vm375_vm2 = vcmask (!%p170_p3), 130048  }
   0x7   : > { %173 = sbr.rel (%p170_p3) target bundleno = 240 (0xf0), region = 32  ;;  %518 = vmatprep.subr.msk.mxu0 (!%p170_p3), %vm266_vm0, %v233_v0  ;;  %532 = vmatprep.subr.msk.mxu1 (!%p170_p3), %vm266_vm0, %v233_v0  ;;  %p204_p4 = scmp.lt.s32.totalorder (!%p170_p3), %s493_s18, 63  ;;  %v497_v9 = vld [vmem:[%s659_s2] ss:$0 sm:$0xff] (!%p170_p3) }
   0x8   : > { %519 = vmatpush3.msk.msra.mxu0 (!%p170_p3), %vm266_vm0, %v233_v0  ;;  %533 = vmatpush3.msk.msra.mxu1 (!%p170_p3), %vm266_vm0, %v233_v0 }
   0xe   : > { %s666_s18 = smov (!%p204_p4, %s493_s18), 63 }
   0xf   : > { %s494_s19 = sshll.u32 %s666_s18, 3 }
  0x10   : > { %s207_s22 = scalar_lea.vmem %s657_s0, %s494_s19  ;;  %s223_s27 = scalar_lea.vmem %s660_s3, %s494_s19 }
  0x11   : > { %v225_v1 = vld [vmem:[%s207_s22] sm:$0xff]  ;;  %v226_v3 = vld [vmem:[%s207_s22 + $0x8] sm:$0xff]  ;;  %v227_v5 = vld [vmem:[%s207_s22 + $0x10] sm:$0xff] }
  0x12   : > { %v229_v2 = vld [vmem:[%s207_s22 + $0x20] sm:$0xff]  ;;  %520 = vmatprep.mubr.msk.f32.mxu0 %vm241_vm1, %v225_v1  ;;  %v230_v4 = vld [vmem:[%s207_s22 + $0x28] sm:$0xff]  ;;  %v231_v6 = vld [vmem:[%s207_s22 + $0x30] sm:$0xff] }
  0x13   : > { %526 = vmatprep.mubr.msk.f32.mxu1 %vm241_vm1, %v229_v2  ;;  %521 = vmatmul.mubr.msk.f32.vlgmr.msra.gmra.mrb[0].mxu0 %vm241_vm1, %v226_v3  ;;  %v228_v7 = vld [vmem:[%s207_s22 + $0x18] sm:$0xff] }
  0x14   : > { %527 = vmatmul.mubr.msk.f32.vlgmr.msra.gmra.mrb[0].mxu1 %vm241_vm1, %v230_v4  ;;  %523 = vmatprep.mubr.msk.f32.mxu0 %vm241_vm1, %v227_v5  ;;  %v232_v8 = vld [vmem:[%s207_s22 + $0x38] sm:$0xff] }
  0x15   : > { %529 = vmatprep.mubr.msk.f32.mxu1 %vm241_vm1, %v231_v6 }
  0x17   : > { %524 = vmatmul.mubr.msk.f32.gmra.mrb[2].mxu0 %vm241_vm1, %v228_v7 }
  0x18   : > { %530 = vmatmul.mubr.msk.f32.gmra.mrb[2].mxu1 %vm241_vm1, %v232_v8 }
  0xe6   : > { %v522_v10 = vpop.f32.mrb[0].mxu0 }
  0xe7   : > { %v528_v11 = vpop.f32.mrb[0].mxu1  ;;  %v342_v12 = vadd.f32 %v522_v10, %v497_v9  ;;  %v336_v14 = vpop.f32.mrb[1].mxu0 }
  0xe8   : > { %v362_v13 = vadd.f32 %v528_v11, %v497_v9  ;;  %v356_v15 = vpop.f32.mrb[1].mxu1  ;;  %v337_v16 = vadd.f32 %v497_v9, %v336_v14 }
  0xe9   : > { %v357_v17 = vadd.f32 %v497_v9, %v356_v15  ;;  %377 = vst.msk [vmem:[%s223_s27 + $0x8] sm:$0xff] %vm375_vm2, %v342_v12 }
  0xea   : > { %381 = vst.msk [vmem:[%s223_s27 + $0x28] sm:$0xff] %vm375_vm2, %v362_v13  ;;  %376 = vst.msk [vmem:[%s223_s27] sm:$0xff] %vm375_vm2, %v337_v16  ;;  %v525_v18 = vpop.f32.mrb[2].mxu0 }
  0xeb   : > { %380 = vst.msk [vmem:[%s223_s27 + $0x20] sm:$0xff] %vm375_vm2, %v357_v17  ;;  %v531_v19 = vpop.f32.mrb[2].mxu1  ;;  %v352_v20 = vadd.f32 %v525_v18, %v497_v9  ;;  %v346_v22 = vpop.f32.mrb[3].mxu0 }
  0xec   : > { %v372_v21 = vadd.f32 %v531_v19, %v497_v9  ;;  %v366_v23 = vpop.f32.mrb[3].mxu1  ;;  %v347_v24 = vadd.f32 %v497_v9, %v346_v22 }
  0xed   : > { %v367_v25 = vadd.f32 %v497_v9, %v366_v23  ;;  %379 = vst.msk [vmem:[%s223_s27 + $0x18] sm:$0xff] %vm375_vm2, %v352_v20 }
  0xee   : > { %383 = vst.msk [vmem:[%s223_s27 + $0x38] sm:$0xff] %vm375_vm2, %v372_v21  ;;  %378 = vst.msk [vmem:[%s223_s27 + $0x10] sm:$0xff] %vm375_vm2, %v347_v24 }
  0xef   : > { %382 = vst.msk [vmem:[%s223_s27 + $0x30] sm:$0xff] %vm375_vm2, %v367_v25 }
  0xf0 PF: > { %s13_s14 = sadd.s32 1, %s580_s14   ;;  %s661_s12 = smov %s576_s13 }
  0xf1   : > { %p10_p5 = scmp.ge.s32.totalorder %s13_s14, 10   ;;  %s662_s13 = smov %s664_s15 }
  0xf3   :  { %12 = sbr.rel (!%p10_p5) target bundleno = 2 (0x2), region = 68 }

</bundles_post_ra>
